<compile_context>
chip_gen: v7x
topology: tpu7x:2x2x1
jax: 0.10.0
libtpu: 0.0.40
codegen_flags: <defaults>
</compile_context>

<pallas_src>
import jax
import jax.numpy as jnp
from jax.experimental import pallas as pl
from jax.experimental.pallas import tpu as pltpu


def suppress_net_kernel(x_ref, w1_ref, b1_ref, w2_ref, b2_ref, o_ref):
    """One lane-dense column tile of the SuppressNet forward pass.

    x_ref : (S, TN) VMEM   -- column n = flattened (batch, class) instance, lane-dense
    w1_ref: (E, S)  VMEM   -- mlp1 weight (resident across the grid)
    b1_ref: (E, 1)  VMEM   -- mlp1 bias (resident)
    w2_ref: (E, 1)  VMEM   -- mlp2 weight (resident)
    b2_ref: (1,)    SMEM   -- mlp2 bias scalar
    o_ref : (1, TN) VMEM   -- sigmoid output, lane-dense
    """
    x = x_ref[...].astype(jnp.float32)                        # (S, TN)

    # InstanceNorm1d: per-column normalization over the segment (sublane) axis.
    # Biased variance, eps=1e-5, no affine -> matches PyTorch defaults.
    mean = jnp.mean(x, axis=0, keepdims=True)                 # (1, TN)
    centered = x - mean
    var = jnp.mean(centered * centered, axis=0, keepdims=True)
    xn = centered * jax.lax.rsqrt(var + 1e-5)                 # (S, TN)

    # mlp1 on the MXU: (E, S) @ (S, TN) -> (E, TN); bias + ReLU on the VPU.
    h = jnp.dot(w1_ref[...], xn,
                preferred_element_type=jnp.float32,
                precision=jax.lax.Precision.HIGHEST)
    h = jnp.maximum(h + b1_ref[...], 0.0)                     # (E, TN)

    # mlp2 (E -> 1) as a weighted sublane reduce (XLU slot; keeps VALU free).
    logit = jnp.sum(h * w2_ref[...], axis=0, keepdims=True) + b2_ref[0]   # (1, TN)

    # Sigmoid: exp on the EUP + exact reciprocal.
    o_ref[...] = (1.0 / (1.0 + jnp.exp(-logit))).astype(o_ref.dtype)


def suppress_net_forward(x, w1, b1, w2, b2, *, col_tile=32768, x_dtype=None):
    """x: (B, seglen, n_class).  Params in nn.Linear layout:
       w1 (E, S), b1 (E,), w2 (1, E), b2 (1,), with E = 2*seglen.
       Returns (B, n_class) f32.

       col_tile: lane-dense column tile over the flattened B*n_class axis.
       x_dtype : optional HBM dtype for x (e.g. jnp.bfloat16 on v6e/v7x to halve
                 HBM traffic); all in-kernel math stays f32.
    """
    B, S, C = x.shape
    E = w1.shape[0]
    N = B * C

    # Lane-dense relayout: column n = b*C + c; the norm reduces over axis 0 (S).
    # (Layout plumbing only; ideally the producer emits (S, B*C) directly.)
    xr = jnp.transpose(x, (1, 0, 2)).reshape(S, N)
    if x_dtype is not None:
        xr = xr.astype(x_dtype)

    # Tiny one-time parameter reshapes.
    w1r = w1.reshape(E, S).astype(jnp.float32)
    b1r = b1.reshape(E, 1).astype(jnp.float32)
    w2r = w2.reshape(E, 1).astype(jnp.float32)
    b2r = b2.reshape(1).astype(jnp.float32)

    # Column tile: multiple of 128 lanes (or the full axis), ~1 MiB per input buffer.
    lane = 128
    tn = N if N <= col_tile else max(lane, (col_tile // lane) * lane)
    # v7x has 2 TensorCores: ensure >=2 grid steps when there is enough data.
    if pl.cdiv(N, tn) < 2 and N >= 2 * lane * lane:
        half = pl.cdiv(N, 2 * lane) * lane          # ceil(N/2) rounded up to 128 lanes
        if half < N:
            tn = half
    grid = (pl.cdiv(N, tn),)

    # VMEM budget: 2x double-buffered input tile + 2x output tile + resident params
    # + f32 intermediates (xn, h, a few (1, tn) temporaries) + 1 MiB slack.
    # Capped at 32 MiB (v7x scoped default; well under its 64 MiB physical VMEM).
    in_tile_bytes = S * tn * xr.dtype.itemsize
    out_tile_bytes = tn * 4
    param_bytes = (E * S + 2 * E + 1) * 4
    interm_bytes = (S + E + 6) * tn * 4
    vmem_limit = int(min(max(2 * in_tile_bytes + 2 * out_tile_bytes + param_bytes
                             + interm_bytes + (1 << 20), 4 << 20), 32 << 20))

    cost = pl.CostEstimate(
        flops=int(N * (6 * S + 2 * E * S + 4 * E + 2)),
        transcendentals=int(2 * N),
        bytes_accessed=int(xr.size * xr.dtype.itemsize + N * 4 + param_bytes),
    )

    out_flat = pl.pallas_call(
        suppress_net_kernel,
        out_shape=jax.ShapeDtypeStruct((1, N), jnp.float32),
        grid=grid,
        in_specs=[
            pl.BlockSpec((S, tn), lambda i: (0, i)),            # x column tiles (pipelined)
            pl.BlockSpec((E, S), lambda i: (0, 0)),             # w1, VMEM-resident
            pl.BlockSpec((E, 1), lambda i: (0, 0)),             # b1, VMEM-resident
            pl.BlockSpec((E, 1), lambda i: (0, 0)),             # w2, VMEM-resident
            pl.BlockSpec(memory_space=pltpu.MemorySpace.SMEM),  # b2 scalar
        ],
        out_specs=pl.BlockSpec((1, tn), lambda i: (0, i)),      # lane-dense output slab
        compiler_params=pltpu.CompilerParams(
            dimension_semantics=("parallel",),   # shards column tiles across TCs on v7x
            vmem_limit_bytes=vmem_limit,
        ),
        cost_estimate=cost,
    )(xr, w1r, b1r, w2r, b2r)

    return out_flat.reshape(B, C)


def suppress_net_reference(x, w1, b1, w2, b2):
    """Pure-JAX reference matching the PyTorch module (f32 matmul precision)."""
    xp = jnp.transpose(x, (0, 2, 1))                            # (B, C, S)
    mean = jnp.mean(xp, axis=-1, keepdims=True)
    var = jnp.mean((xp - mean) ** 2, axis=-1, keepdims=True)
    xn = (xp - mean) * jax.lax.rsqrt(var + 1e-5)
    h = jnp.maximum(
        jnp.einsum("bcs,es->bce", xn, w1, precision=jax.lax.Precision.HIGHEST) + b1, 0.0)
    logit = jnp.einsum("bce,oe->bco", h, w2, precision=jax.lax.Precision.HIGHEST) + b2
    return jax.nn.sigmoid(logit)[..., 0]


def init_params(key, seglen):
    """Deterministic synthetic parameters in nn.Linear layout."""
    emb = 2 * seglen
    k1, k2, k3, k4 = jax.random.split(key, 4)
    bound1 = 1.0 / jnp.sqrt(float(seglen))
    w1 = jax.random.uniform(k1, (emb, seglen), jnp.float32, -bound1, bound1)
    b1 = jax.random.uniform(k2, (emb,), jnp.float32, -bound1, bound1)
    bound2 = 1.0 / jnp.sqrt(float(emb))
    w2 = jax.random.uniform(k3, (1, emb), jnp.float32, -bound2, bound2)
    b2 = jax.random.uniform(k4, (1,), jnp.float32, -bound2, bound2)
    return w1, b1, w2, b2


if __name__ == "__main__":
    # opt = {'num_of_class': 5, 'segment_size': 8}  -> n_class=4, seglen=8, emb=16
    B, SEGLEN, N_CLASS = 2, 8, 4

    key = jax.random.PRNGKey(0)
    kx, kp = jax.random.split(key)
    x = jax.random.normal(kx, (B, SEGLEN, N_CLASS), jnp.float32)
    w1, b1, w2, b2 = init_params(kp, SEGLEN)

    out = suppress_net_forward(x, w1, b1, w2, b2)
    out = jax.block_until_ready(out)

    ref = suppress_net_reference(x, w1, b1, w2, b2)
    assert out.shape == (B, N_CLASS), out.shape
    assert jnp.allclose(out, ref, rtol=1e-4, atol=1e-4), (out, ref)
    assert bool(jnp.all((out >= 0.0) & (out <= 1.0)))   # sigmoid range

    print("KERNEL_OK")
</pallas_src>

<mosaic_0001>
module attributes {stable_mosaic.version = 11 : i64} {
  func.func @suppress_net_kernel(%arg0: i32, %arg1: memref<8x8xf32, #tpu.memory_space<vmem>>, %arg2: memref<16x8xf32, #tpu.memory_space<vmem>>, %arg3: memref<16x1xf32, #tpu.memory_space<vmem>>, %arg4: memref<16x1xf32, #tpu.memory_space<vmem>>, %arg5: memref<1xf32, #tpu.memory_space<smem>>, %arg6: memref<1x8xf32, #tpu.memory_space<vmem>>) attributes {dimension_semantics = [#tpu.dimension_semantics<parallel>], iteration_bounds = array<i64: 1>, scalar_prefetch = 0 : i64, scratch_operands = 0 : i64, tpu.core_type = #tpu.core_type<tc>, window_params = [{transform_indices = @transform_0, window_bounds = array<i64: 8, 8>}, {pipeline_mode = #tpu.pipeline_mode<synchronous>, transform_indices = @transform_1, window_bounds = array<i64: 16, 8>}, {pipeline_mode = #tpu.pipeline_mode<synchronous>, transform_indices = @transform_2, window_bounds = array<i64: 16, 1>}, {pipeline_mode = #tpu.pipeline_mode<synchronous>, transform_indices = @transform_3, window_bounds = array<i64: 16, 1>}, {transform_indices = @transform_4, window_bounds = array<i64: 1>}, {transform_indices = @transform_5, window_bounds = array<i64: 1, 8>}]} {
    %c0 = arith.constant 0 : index
    %c0_0 = arith.constant 0 : index
    %0 = vector.load %arg1[%c0, %c0_0] : memref<8x8xf32, #tpu.memory_space<vmem>>, vector<8x8xf32>
    %cst = arith.constant dense<0.000000e+00> : vector<8xf32>
    %1 = vector.multi_reduction <add>, %0, %cst [0] : vector<8x8xf32> to vector<8xf32>
    %2 = vector.shape_cast %1 : vector<8xf32> to vector<1x8xf32>
    %cst_1 = arith.constant 8.000000e+00 : f32
    %3 = vector.broadcast %cst_1 : f32 to vector<1x8xf32>
    %4 = arith.divf %2, %3 : vector<1x8xf32>
    %5 = vector.broadcast %4 : vector<1x8xf32> to vector<8x8xf32>
    %6 = arith.subf %0, %5 : vector<8x8xf32>
    %7 = arith.mulf %6, %6 : vector<8x8xf32>
    %cst_2 = arith.constant dense<0.000000e+00> : vector<8xf32>
    %8 = vector.multi_reduction <add>, %7, %cst_2 [0] : vector<8x8xf32> to vector<8xf32>
    %9 = vector.shape_cast %8 : vector<8xf32> to vector<1x8xf32>
    %cst_3 = arith.constant 8.000000e+00 : f32
    %10 = vector.broadcast %cst_3 : f32 to vector<1x8xf32>
    %11 = arith.divf %9, %10 : vector<1x8xf32>
    %cst_4 = arith.constant 9.99999974E-6 : f32
    %12 = vector.broadcast %cst_4 : f32 to vector<1x8xf32>
    %13 = arith.addf %11, %12 : vector<1x8xf32>
    %14 = math.rsqrt %13 : vector<1x8xf32>
    %15 = vector.broadcast %14 : vector<1x8xf32> to vector<8x8xf32>
    %16 = arith.mulf %6, %15 : vector<8x8xf32>
    %c0_5 = arith.constant 0 : index
    %c0_6 = arith.constant 0 : index
    %17 = vector.load %arg2[%c0_5, %c0_6] : memref<16x8xf32, #tpu.memory_space<vmem>>, vector<16x8xf32>
    %cst_7 = arith.constant dense<0.000000e+00> : vector<16x8xf32>
    %18 = tpu.matmul %17, %16, %cst_7 {dimension_numbers = #tpu.dot_dimension_numbers<[1], [0], [0], [1], [0, 0, 1, 1], [], []>, precision = #tpu.contract_precision<fp32>} : vector<16x8xf32>, vector<8x8xf32>, vector<16x8xf32> -> vector<16x8xf32>
    %c0_8 = arith.constant 0 : index
    %c0_9 = arith.constant 0 : index
    %19 = vector.load %arg3[%c0_8, %c0_9] : memref<16x1xf32, #tpu.memory_space<vmem>>, vector<16x1xf32>
    %20 = vector.broadcast %19 : vector<16x1xf32> to vector<16x8xf32>
    %21 = arith.addf %18, %20 : vector<16x8xf32>
    %cst_10 = arith.constant 0.000000e+00 : f32
    %22 = vector.broadcast %cst_10 : f32 to vector<16x8xf32>
    %23 = arith.maximumf %21, %22 : vector<16x8xf32>
    %c0_11 = arith.constant 0 : index
    %c0_12 = arith.constant 0 : index
    %24 = vector.load %arg4[%c0_11, %c0_12] : memref<16x1xf32, #tpu.memory_space<vmem>>, vector<16x1xf32>
    %25 = vector.broadcast %24 : vector<16x1xf32> to vector<16x8xf32>
    %26 = arith.mulf %23, %25 : vector<16x8xf32>
    %cst_13 = arith.constant dense<0.000000e+00> : vector<8xf32>
    %27 = vector.multi_reduction <add>, %26, %cst_13 [0] : vector<16x8xf32> to vector<8xf32>
    %28 = vector.shape_cast %27 : vector<8xf32> to vector<1x8xf32>
    %c0_14 = arith.constant 0 : index
    %29 = memref.load %arg5[%c0_14] : memref<1xf32, #tpu.memory_space<smem>>
    %30 = vector.broadcast %29 : f32 to vector<1x8xf32>
    %31 = arith.addf %28, %30 : vector<1x8xf32>
    %cst_15 = arith.constant 0.000000e+00 : f32
    %32 = vector.broadcast %cst_15 : f32 to vector<1x8xf32>
    %33 = arith.subf %32, %31 : vector<1x8xf32>
    %34 = math.exp %33 : vector<1x8xf32>
    %cst_16 = arith.constant 1.000000e+00 : f32
    %35 = vector.broadcast %cst_16 : f32 to vector<1x8xf32>
    %36 = arith.addf %35, %34 : vector<1x8xf32>
    %cst_17 = arith.constant 1.000000e+00 : f32
    %37 = vector.broadcast %cst_17 : f32 to vector<1x8xf32>
    %38 = arith.divf %37, %36 : vector<1x8xf32>
    %c0_18 = arith.constant 0 : index
    %c0_19 = arith.constant 0 : index
    %39 = vector.load %arg6[%c0_18, %c0_19] : memref<1x8xf32, #tpu.memory_space<vmem>>, vector<1x8xf32>
    tpu.vector_store %arg6[%c0_18, %c0_19], %38 {strides = array<i32>} : memref<1x8xf32, #tpu.memory_space<vmem>>, vector<1x8xf32>,
    return
  }
  func.func @transform_0(%arg0: i32) -> (i32, i32) {
    %c0_i32 = arith.constant 0 : i32
    %c0_i32_0 = arith.constant 0 : i32
    return %c0_i32, %arg0 : i32, i32
  }
  func.func @transform_1(%arg0: i32) -> (i32, i32) {
    %c0_i32 = arith.constant 0 : i32
    %c0_i32_0 = arith.constant 0 : i32
    %c0_i32_1 = arith.constant 0 : i32
    return %c0_i32, %c0_i32_0 : i32, i32
  }
  func.func @transform_2(%arg0: i32) -> (i32, i32) {
    %c0_i32 = arith.constant 0 : i32
    %c0_i32_0 = arith.constant 0 : i32
    %c0_i32_1 = arith.constant 0 : i32
    return %c0_i32, %c0_i32_0 : i32, i32
  }
  func.func @transform_3(%arg0: i32) -> (i32, i32) {
    %c0_i32 = arith.constant 0 : i32
    %c0_i32_0 = arith.constant 0 : i32
    %c0_i32_1 = arith.constant 0 : i32
    return %c0_i32, %c0_i32_0 : i32, i32
  }
  func.func @transform_4(%arg0: i32) -> i32 {
    %c0_i32 = arith.constant 0 : i32
    %c0_i32_0 = arith.constant 0 : i32
    return %c0_i32 : i32
  }
  func.func @transform_5(%arg0: i32) -> (i32, i32) {
    %c0_i32 = arith.constant 0 : i32
    %c0_i32_0 = arith.constant 0 : i32
    return %c0_i32, %arg0 : i32, i32
  }
}

</mosaic_0001>

<bundles_post_ra>
// kernel: tpu_custom_call.1
= control target key start
LH: loop header
LB: loop body
LE: loop exit
PB: predicated region body
PF: predicated region fallthrough
CT: control target
= control target key end

     0   :  { %vm23_vm0 = vcmask 64512   ;;  %v699_v4 = vmov 0   ;;  %s779_s0 = inlined_call_operand.vmem [shape: f32[8,8], index: 0, kind: input, shape index: {}]   ;;  %s780_s1 = inlined_call_operand.vmem [shape: f32[16,8], index: 1, kind: input, shape index: {}]   ;;  %s781_s2 = inlined_call_operand.vmem [shape: f32[16,1], index: 2, kind: input, shape index: {}]   ;;  %s782_s3 = inlined_call_operand.vmem [shape: f32[16,1], index: 3, kind: input, shape index: {}]   ;;  %s783_s4 = inlined_call_operand.<no memory space> [shape: f32[1], index: 4, kind: input, shape index: {}]   ;;  %s784_s5 = inlined_call_operand.hbm [shape: f32[1,8], index: 5, kind: output, shape index: {}]  }
   0x1   :  { %v22_v0 = vld [vmem:[%s779_s0] sm:$0xff]  ;;  %667 = vset.pattern.permute.xlu0 %v699_v4  ;;  %668 = vset.pattern.permute.xlu1 %v699_v4 }
   0x2   :  { %v46_v1 = vld [vmem:[%s780_s1] sm:$0xff]  ;;  %v24_v2 = vsel %vm23_vm0, %v22_v0, 0.0 }
   0x3   :  { %v61_v3 = vsel %vm23_vm0, %v46_v1, 0  ;;  %v48_v5 = vld [vmem:[%s781_s2] sm:$0xff]  ;;  %v25_v7 = vrot.slane %v24_v2, 4 }
   0x4   :  { %v557_v6 = vld [vmem:[%s782_s3] sm:$0xff]  ;;  %v745_v8 = vand.u32 4294901760, %v61_v3  ;;  %52 = vperm.xlu0 %667, %v48_v5  }
   0x5   :  { %561 = vperm.xlu1 %668, %v557_v6  }
   0x6   :  { %11 = vsyncpa [#allocation4], 0  ;;  %v49_v9 = vld [vmem:[%s781_s2 + $0x8] sm:$0xff]  ;;  %v26_v11 = vadd.f32 %v25_v7, %v24_v2  ;;  %v133_v12 = vsub.f32 %v61_v3, %v745_v8  ;;  %v581_v6 = vstv %s783_s4  ;;  %s700_s30 = smov [#allocation3]   ;;  %vm589_vm1 = vcmask 57344  }
   0x7   :  { %v558_v10 = vld [vmem:[%s782_s3 + $0x8] sm:$0xff]  ;;  %s597_s6 = sshll.u32 %s700_s30, 4  ;;  %s598_s6 = int_to_ptr.vmem [resolvable:$true] %s597_s6 }
   0x8   :  { %v27_v13 = vrot.slane %v26_v11, 2  ;;  %v134_v14 = vand.u32 4294901760, %v133_v12  ;;  %57 = vperm.xlu0 %667, %v49_v9   ;;  %v47_v28 = vld [vmem:[%s780_s1 + $0x8] sm:$0xff]  ;;  %s675_s7 = scalar_lea.vmem %s598_s6, 16  ;;  %s679_s8 = scalar_lea.vmem %s598_s6, 32 }
   0x9   :  { %566 = vperm.xlu1 %668, %v558_v10   ;;  %v64_v31 = vsel %vm23_vm0, %v47_v28, 0  ;;  %p676_p0 = scmp.ne.s32.totalorder %s598_s6, %s675_s7  ;;  %p680_p1 = scmp.lt.s32.totalorder %s598_s6, %s598_s6 }
   0xa   :  { %v28_v15 = vadd.f32 %v27_v13, %v26_v11  ;;  %v135_v16 = vsub.f32 %v133_v12, %v134_v14  ;;  %640 = vmatprep.mubr.f32.mxu0 %v134_v14  ;;  %v142_v33 = vand.u32 4294901760, %v64_v31  ;;  %p681_p2 = scmp.lt.s32.totalorder %s679_s8, %s675_s7 }
   0xc   :  { %v29_v17 = vrot.slane %v28_v15, 1  ;;  %v136_v18 = vand.u32 4294901760, %v135_v16  ;;  %v143_v35 = vsub.f32 %v64_v31, %v142_v33  ;;  %p682_p3 = por %p681_p2, %p680_p1 }
   0xe   :  { %v30_v19 = vadd.f32 %v29_v17, %v28_v15  ;;  %625 = vmatprep.mubr.f32.mxu1 %v136_v18  ;;  %v144_v36 = vand.u32 4294901760, %v143_v35  ;;  %p683_p4 = pnand %p682_p3, %p676_p0 }
  0x10   :  { %v32_v20 = vmul.f32 0.125, %v30_v19  ;;  %v145_v37 = vsub.f32 %v143_v35, %v144_v36 }
  0x12   :  { %v33_v21 = vsub.f32 %v22_v0, %v32_v20  ;;  %v146_v41 = vand.u32 4294901760, %v145_v37 }
  0x14   :  { %v34_v22 = vmul.f32 %v33_v21, %v33_v21 }
  0x16   :  { %v35_v23 = vsel %vm23_vm0, %v34_v22, 0.0 }
  0x17   :  { %v36_v24 = vrot.slane %v35_v23, 4 }
  0x19   :  { %v37_v25 = vadd.f32 %v36_v24, %v35_v23 }
  0x1b   :  { %v38_v26 = vrot.slane %v37_v25, 2 }
  0x1d   :  { %v39_v27 = vadd.f32 %v38_v26, %v37_v25 }
  0x1f   :  { %v40_v29 = vrot.slane %v39_v27, 1 }
  0x21   :  { %v41_v30 = vadd.f32 %v40_v29, %v39_v27 }
  0x23   :  { %v42_v32 = vmul.f32 0.125, %v41_v30 }
  0x25   :  { %v43_v34 = vadd.f32 1e-05, %v42_v32 }
  0x27   :  { %669 = vrsqrt.f32 %v43_v34 }
  0x31   :  { %v670_v38 = vpop.eup %669 }
  0x32   :  { %v45_v39 = vmul.f32 %v670_v38, %v33_v21 }
  0x34   :  { %v67_v40 = vand.u32 4294901760, %v45_v39 }
  0x36   :  { %623 = vmatprep.subr.mxu1 %v67_v40  ;;  %638 = vmatprep.subr.mxu0 %v67_v40  ;;  %v154_v42 = vsub.f32 %v45_v39, %v67_v40 }
  0x37   :  { %624 = vmatpush3.msra.mxu1 %v67_v40  ;;  %639 = vmatpush3.msra.mxu0 %v67_v40 }
  0x38   :  { %626 = vmatmul.mubr.f32.vlgmr.msra.gmra.mrb[0].mxu1 %v146_v41  ;;  %641 = vmatmul.mubr.f32.vlgmr.msra.gmra.mrb[0].mxu0 %v144_v36  ;;  %v155_v43 = vand.u32 4294901760, %v154_v42 }
  0x39   :  { %630 = vmatprep.mubr.f32.mxu1 %v745_v8  ;;  %645 = vmatprep.mubr.f32.mxu0 %v745_v8 }
  0x3a   :  { %v156_v44 = vsub.f32 %v154_v42, %v155_v43  ;;  %643 = vmatprep.subr.mxu0 %v155_v43 }
  0x3b   :  { %644 = vmatpush3.msra.mxu0 %v155_v43 }
  0x3c   :  { %v157_v45 = vand.u32 4294901760, %v156_v44  ;;  %648 = vmatprep.subr.mxu0 %v67_v40 }
  0x3e   :  { %628 = vmatprep.subr.mxu1 %v157_v45 }
  0x3f   :  { %629 = vmatpush3.msra.mxu1 %v157_v45 }
  0x40   :  { %631 = vmatmul.mubr.f32.vlgmr.msra.gmra.mrb[0].mxu1 %v142_v33  ;;  %646 = vmatmul.mubr.f32.vlgmr.msra.gmra.mrb[0].mxu0 %v142_v33 }
  0x41   :  { %633 = vmatprep.subr.mxu1 %v154_v42  ;;  %635 = vmatprep.mubr.f32.mxu1 %v133_v12 }
  0x42   :  { %634 = vmatpush3.msra.mxu1 %v154_v42  ;;  %649 = vmatpush3.msra.mxu0 %v67_v40 }
  0x43   :  { %650 = vmatprep.mubr.f32.mxu0 %v745_v8 }
  0x48   :  { %636 = vmatmul.mubr.f32.vlgmr.msra.gmra.mrb[0].mxu1 %v143_v35  ;;  %651 = vmatmul.mubr.f32.vlgmr.msra.gmra.mrb[0].mxu0 %v142_v33 }
  0x83   :  { %v53_v46 = vpop.permute.xlu0 %52 }
  0x84   :  { %v562_v48 = vpop.permute.xlu1 %561 }
  0x87   :  { %v58_v47 = vpop.permute.xlu0 %57 }
  0x88   :  { %v567_v59 = vpop.permute.xlu1 %566 }
 0x11b   :  { %v637_v49 = vpop.f32.mrb[0].mxu1  ;;  %v652_v50 = vpop.f32.mrb[0].mxu0 }
 0x11c   :  { %v653_v51 = vadd.f32 %v637_v49, %v58_v47  ;;  %v304_v52 = vpop.f32.mrb[1].mxu1  ;;  %v545_v53 = vpop.f32.mrb[1].mxu0 }
 0x11d   :  { %v655_v54 = vadd.f32 %v304_v52, %v53_v46 }
 0x11e   :  { %v654_v55 = vadd.f32 %v653_v51, %v652_v50 }
 0x11f   :  { %v656_v56 = vadd.f32 %v655_v54, %v545_v53 }
 0x120   :  { %v556_v57 = vmax.f32 %v654_v55, 0.0 }
 0x121   :  { %v555_v58 = vmax.f32 %v656_v56, 0.0 }
 0x122   :  { %v570_v60 = vmul.f32 %v567_v59, %v556_v57 }
 0x123   :  { %v569_v61 = vmul.f32 %v562_v48, %v555_v58 }
 0x124   :  { %v572_v62 = vsel %vm23_vm0, %v570_v60, 0.0 }
 0x125   :  { %v571_v63 = vsel %vm23_vm0, %v569_v61, 0.0 }
 0x126   :  { %v573_v0 = vadd.f32 %v572_v62, %v571_v63 }
 0x128   :  { %v574_v1 = vrot.slane %v573_v0, 4 }
 0x12a   :  { %v575_v2 = vadd.f32 %v574_v1, %v573_v0 }
 0x12c   :  { %v576_v3 = vrot.slane %v575_v2, 2 }
 0x12e   :  { %v577_v4 = vadd.f32 %v576_v3, %v575_v2 }
 0x130   :  { %v578_v5 = vrot.slane %v577_v4, 1 }
 0x132   :  { %v579_v7 = vadd.f32 %v578_v5, %v577_v4 }
 0x134   :  { %v582_v8 = vadd.f32 %v581_v6, %v579_v7 }
 0x136   :  { %v583_v9 = vsub.f32 0.0, %v582_v8 }
 0x138   :  { %v584_v10 = vmul.f32 1.442695, %v583_v9 }
 0x13a   :  { %671 = vpow2.f32 %v584_v10 }
 0x144   :  { %v672_v11 = vpop.eup %671 }
 0x145   :  { %v586_v12 = vadd.f32 1.0, %v672_v11 }
 0x147   :  { %673 = vrcp.f32 %v586_v12 }
 0x151   :  { %v674_v13 = vpop.eup %673 }
 0x152   :  { %590 = vst.msk [vmem:[#allocation3] sm:$0x1] %vm589_vm1, %v674_v13 }
 0x153   :  { %686 = shalt.err (!%p683_p4)
}
 0x154   :  { %s687_s10 = scalar_lea.hbm %s784_s5, 16 }
 0x155   :  { %p688_p5 = scmp.ne.s32.totalorder %s784_s5, %s687_s10  ;;  %p691_p6 = scmp.lt.u32.totalorder %s687_s10, %s784_s5 }
 0x157   :  { %p693_p7 = pnand %p691_p6, %p688_p5 }
 0x159   :  { %696 = shalt.err (!%p693_p7)
}
 0x15a   :  { %600 = dma.vmem_to_hbm [thread:$0]  %s598_s6, 16, %s784_s5, [#allocation4]  }
 0x15b   :  { %697 = dma.done.wait [#allocation4], 16  }
 0x15c   :  { %698 = vsyncadd [#allocation4], 4294967280 }
 0x15d   :  { %604 = vsyncpa [#allocation4], 1 }

</bundles_post_ra>
